<compile_context>
chip_gen: v5e
topology: v5e:2x2
jax: 0.10.0
libtpu: 0.0.40
codegen_flags: <defaults>
</compile_context>

<pallas_src>
import math
from functools import partial

import jax
import jax.numpy as jnp
from jax.experimental import pallas as pl
from jax.experimental.pallas import tpu as pltpu


# ----------------------------- in-kernel math -----------------------------

def _layernorm(h, gamma, beta, eps):
    mu = jnp.mean(h, axis=-1, keepdims=True)
    var = jnp.mean((h - mu) ** 2, axis=-1, keepdims=True)
    return (h - mu) * jax.lax.rsqrt(var + eps) * gamma + beta


def _mha_ln_kernel(xq_ref, xkv_ref, wq_ref, bq_ref, wkv_ref, bkv_ref,
                   wo_ref, bo_ref, g_ref, bt_ref, o_ref, *, nhead, eps):
    """LayerNorm(xq + MHA(xq, xkv)) for one batch element."""
    xq = xq_ref[0].astype(jnp.float32)        # (Sq, D)
    xkv = xkv_ref[0].astype(jnp.float32)      # (Skv, D)
    Sq, D = xq.shape
    Dh = D // nhead
    scale = 1.0 / math.sqrt(Dh)

    # Fused projections: q = xq @ Wq, [k|v] = xkv @ Wkv  (one matmul for K,V)
    q = jnp.dot(xq, wq_ref[...], preferred_element_type=jnp.float32) + bq_ref[...]
    kv = jnp.dot(xkv, wkv_ref[...], preferred_element_type=jnp.float32) + bkv_ref[...]
    k = kv[:, :D]
    v = kv[:, D:]
    wo = wo_ref[...]

    # Per-head attention via static lane slices; accumulate the output
    # projection per head (== concat(heads) @ Wo) to stay lane-dense.
    acc = jnp.zeros((Sq, D), jnp.float32)
    for h in range(nhead):
        lo, hi = h * Dh, (h + 1) * Dh
        qh = q[:, lo:hi]                                   # (Sq, Dh)
        kh = k[:, lo:hi]                                   # (Skv, Dh)
        vh = v[:, lo:hi]                                   # (Skv, Dh)
        s = jnp.dot(qh, kh.T, preferred_element_type=jnp.float32) * scale
        m = jnp.max(s, axis=-1, keepdims=True)
        p = jnp.exp(s - m)
        denom = jnp.sum(p, axis=-1, keepdims=True)
        p = p * pl.reciprocal(denom, approx=True)
        ov = jnp.dot(p, vh, preferred_element_type=jnp.float32)          # (Sq, Dh)
        acc = acc + jnp.dot(ov, wo[lo:hi, :], preferred_element_type=jnp.float32)

    attn = acc + bo_ref[...]
    y = _layernorm(attn + xq, g_ref[...], bt_ref[...], eps)
    o_ref[0] = y.astype(o_ref.dtype)


def _ffn_ln_body(x, w1_ref, b1_ref, w2_ref, b2_ref, g_ref, bt_ref, eps):
    h = jnp.dot(x, w1_ref[...], preferred_element_type=jnp.float32) + b1_ref[...]
    h = jnp.maximum(h, 0.0)
    y = jnp.dot(h, w2_ref[...], preferred_element_type=jnp.float32) + b2_ref[...]
    return _layernorm(y + x, g_ref[...], bt_ref[...], eps)


def _ffn_ln_kernel(x_ref, w1_ref, b1_ref, w2_ref, b2_ref, g_ref, bt_ref,
                   o_ref, *, eps):
    x = x_ref[0].astype(jnp.float32)
    y = _ffn_ln_body(x, w1_ref, b1_ref, w2_ref, b2_ref, g_ref, bt_ref, eps)
    o_ref[0] = y.astype(o_ref.dtype)


def _ffn_ln_proj_kernel(x_ref, w1_ref, b1_ref, w2_ref, b2_ref, g_ref, bt_ref,
                        wout_ref, bout_ref, o_ref, *, eps):
    """Last decoder FFN: also emits the final vocab logits (fused epilogue)."""
    x = x_ref[0].astype(jnp.float32)
    y = _ffn_ln_body(x, w1_ref, b1_ref, w2_ref, b2_ref, g_ref, bt_ref, eps)
    logits = jnp.dot(y, wout_ref[...], preferred_element_type=jnp.float32) + bout_ref[...]
    o_ref[0] = logits.astype(o_ref.dtype)


# ----------------------------- pallas wrappers -----------------------------

def _row(v):
    return v.reshape(1, -1)


def _full2(r, c):
    return pl.BlockSpec((r, c), lambda i: (0, 0))


def mha_ln(x_q, x_kv, ap, gamma, beta, nhead, eps=1e-5):
    """x_q: (B, Sq, D), x_kv: (B, Skv, D) -> LayerNorm(x_q + MHA(x_q, x_kv))."""
    B, Sq, D = x_q.shape
    Skv = x_kv.shape[1]
    return pl.pallas_call(
        partial(_mha_ln_kernel, nhead=nhead, eps=eps),
        out_shape=jax.ShapeDtypeStruct((B, Sq, D), x_q.dtype),
        grid_spec=pl.GridSpec(
            grid=(B,),
            in_specs=[
                pl.BlockSpec((1, Sq, D), lambda i: (i, 0, 0)),
                pl.BlockSpec((1, Skv, D), lambda i: (i, 0, 0)),
                _full2(D, D), _full2(1, D),          # wq, bq
                _full2(D, 2 * D), _full2(1, 2 * D),  # wkv, bkv
                _full2(D, D), _full2(1, D),          # wo, bo
                _full2(1, D), _full2(1, D),          # gamma, beta
            ],
            out_specs=pl.BlockSpec((1, Sq, D), lambda i: (i, 0, 0)),
        ),
        compiler_params=pltpu.CompilerParams(dimension_semantics=("parallel",)),
    )(x_q, x_kv, ap["wq"], _row(ap["bq"]), ap["wkv"], _row(ap["bkv"]),
      ap["wo"], _row(ap["bo"]), _row(gamma), _row(beta))


def ffn_ln(x, lp, gamma, beta, eps=1e-5):
    B, S, D = x.shape
    Dff = lp["w1"].shape[1]
    return pl.pallas_call(
        partial(_ffn_ln_kernel, eps=eps),
        out_shape=jax.ShapeDtypeStruct((B, S, D), x.dtype),
        grid_spec=pl.GridSpec(
            grid=(B,),
            in_specs=[pl.BlockSpec((1, S, D), lambda i: (i, 0, 0)),
                      _full2(D, Dff), _full2(1, Dff),
                      _full2(Dff, D), _full2(1, D),
                      _full2(1, D), _full2(1, D)],
            out_specs=pl.BlockSpec((1, S, D), lambda i: (i, 0, 0)),
        ),
        compiler_params=pltpu.CompilerParams(dimension_semantics=("parallel",)),
    )(x, lp["w1"], _row(lp["b1"]), lp["w2"], _row(lp["b2"]),
      _row(gamma), _row(beta))


def ffn_ln_proj(x, lp, gamma, beta, w_out, b_out, eps=1e-5):
    B, S, D = x.shape
    Dff = lp["w1"].shape[1]
    V = w_out.shape[1]
    return pl.pallas_call(
        partial(_ffn_ln_proj_kernel, eps=eps),
        out_shape=jax.ShapeDtypeStruct((B, S, V), x.dtype),
        grid_spec=pl.GridSpec(
            grid=(B,),
            in_specs=[pl.BlockSpec((1, S, D), lambda i: (i, 0, 0)),
                      _full2(D, Dff), _full2(1, Dff),
                      _full2(Dff, D), _full2(1, D),
                      _full2(1, D), _full2(1, D),
                      _full2(D, V), _full2(1, V)],
            out_specs=pl.BlockSpec((1, S, V), lambda i: (i, 0, 0)),
        ),
        compiler_params=pltpu.CompilerParams(dimension_semantics=("parallel",)),
    )(x, lp["w1"], _row(lp["b1"]), lp["w2"], _row(lp["b2"]),
      _row(gamma), _row(beta), w_out, _row(b_out))


# ----------------------------- model pieces -----------------------------

def encoder_layer(x, lp, nhead):
    # post-norm (PyTorch default norm_first=False), dropout = identity (eval)
    x = mha_ln(x, x, lp["sa"], lp["ln1_g"], lp["ln1_b"], nhead)
    x = ffn_ln(x, lp, lp["ln2_g"], lp["ln2_b"])
    return x


def decoder_layer(x, memory, lp, nhead, w_out=None, b_out=None):
    x = mha_ln(x, x, lp["sa"], lp["ln1_g"], lp["ln1_b"], nhead)
    x = mha_ln(x, memory, lp["ca"], lp["ln2_g"], lp["ln2_b"], nhead)
    if w_out is None:
        return ffn_ln(x, lp, lp["ln3_g"], lp["ln3_b"])
    return ffn_ln_proj(x, lp, lp["ln3_g"], lp["ln3_b"], w_out, b_out)


def date_transformer_forward(params, src_tokens, tgt_tokens):
    emb = params["embedding"]
    nhead = params["nhead"]

    # embedding gather + PE add in plain JAX (XLA fuses the add into the gather)
    Ssrc = src_tokens.shape[1]
    Stgt = tgt_tokens.shape[1]
    x = emb[src_tokens] + params["pe_src"][None, :Ssrc, :]
    t = emb[tgt_tokens] + params["pe_tgt"][None, :Stgt, :]

    for lp in params["enc_layers"]:
        x = encoder_layer(x, lp, nhead)
    memory = x

    y = t
    n_dec = len(params["dec_layers"])
    for i, lp in enumerate(params["dec_layers"]):
        if i + 1 < n_dec:
            y = decoder_layer(y, memory, lp, nhead)
        else:
            # last decoder layer also emits the final vocab logits
            y = decoder_layer(y, memory, lp, nhead,
                              w_out=params["w_out"], b_out=params["b_out"])
    return y  # (B, Stgt, vocab)


# ----------------------------- init -----------------------------

def sinusoid_pe(max_len, d_model):
    position = jnp.arange(max_len, dtype=jnp.float32)[:, None]
    div_term = jnp.exp(jnp.arange(0, d_model, 2, dtype=jnp.float32)
                       * (-math.log(10000.0) / d_model))
    pe = jnp.zeros((max_len, d_model), jnp.float32)
    pe = pe.at[:, 0::2].set(jnp.sin(position * div_term))
    pe = pe.at[:, 1::2].set(jnp.cos(position * div_term))
    return pe


def _dense(key, shape, scale=0.05):
    return scale * jax.random.normal(key, shape, dtype=jnp.float32)


def _attn_params(key, d_model):
    ks = jax.random.split(key, 4)
    wk = _dense(ks[1], (d_model, d_model))
    wv = _dense(ks[2], (d_model, d_model))
    return {
        "wq": _dense(ks[0], (d_model, d_model)),
        "bq": jnp.zeros((d_model,), jnp.float32),
        "wkv": jnp.concatenate([wk, wv], axis=1),      # fused K|V projection
        "bkv": jnp.zeros((2 * d_model,), jnp.float32),
        "wo": _dense(ks[3], (d_model, d_model)),
        "bo": jnp.zeros((d_model,), jnp.float32),
    }


def _enc_layer_params(key, d_model, d_ff):
    ks = jax.random.split(key, 3)
    return {
        "sa": _attn_params(ks[0], d_model),
        "w1": _dense(ks[1], (d_model, d_ff)), "b1": jnp.zeros((d_ff,), jnp.float32),
        "w2": _dense(ks[2], (d_ff, d_model)), "b2": jnp.zeros((d_model,), jnp.float32),
        "ln1_g": jnp.ones((d_model,), jnp.float32), "ln1_b": jnp.zeros((d_model,), jnp.float32),
        "ln2_g": jnp.ones((d_model,), jnp.float32), "ln2_b": jnp.zeros((d_model,), jnp.float32),
    }


def _dec_layer_params(key, d_model, d_ff):
    ks = jax.random.split(key, 4)
    return {
        "sa": _attn_params(ks[0], d_model),
        "ca": _attn_params(ks[1], d_model),
        "w1": _dense(ks[2], (d_model, d_ff)), "b1": jnp.zeros((d_ff,), jnp.float32),
        "w2": _dense(ks[3], (d_ff, d_model)), "b2": jnp.zeros((d_model,), jnp.float32),
        "ln1_g": jnp.ones((d_model,), jnp.float32), "ln1_b": jnp.zeros((d_model,), jnp.float32),
        "ln2_g": jnp.ones((d_model,), jnp.float32), "ln2_b": jnp.zeros((d_model,), jnp.float32),
        "ln3_g": jnp.ones((d_model,), jnp.float32), "ln3_b": jnp.zeros((d_model,), jnp.float32),
    }


def init_params(key, vocab_size, d_model, nhead, num_enc, num_dec, d_ff):
    ks = jax.random.split(key, 3 + num_enc + num_dec)
    return {
        "nhead": nhead,
        "embedding": _dense(ks[0], (vocab_size, d_model), scale=1.0),
        "pe_src": sinusoid_pe(29, d_model),
        "pe_tgt": sinusoid_pe(11, d_model),
        "enc_layers": [_enc_layer_params(ks[3 + i], d_model, d_ff)
                       for i in range(num_enc)],
        "dec_layers": [_dec_layer_params(ks[3 + num_enc + i], d_model, d_ff)
                       for i in range(num_dec)],
        "w_out": _dense(ks[1], (d_model, vocab_size)),
        "b_out": jnp.zeros((vocab_size,), jnp.float32),
    }


# ----------------------------- main -----------------------------

if __name__ == "__main__":
    # small-shape instantiation of DateTransformer
    vocab_size = 16
    d_model = 32
    nhead = 4
    num_encoder_layers = 2
    num_decoder_layers = 2
    dim_feedforward = 64

    batch = 2
    src_len = 8        # <= max_len 29
    tgt_len = 8        # <= max_len 11

    key = jax.random.PRNGKey(0)
    k_param, k_src, k_tgt = jax.random.split(key, 3)

    params = init_params(k_param, vocab_size, d_model, nhead,
                         num_encoder_layers, num_decoder_layers, dim_feedforward)

    src = jax.random.randint(k_src, (batch, src_len), 0, vocab_size, dtype=jnp.int32)
    tgt = jax.random.randint(k_tgt, (batch, tgt_len), 0, vocab_size, dtype=jnp.int32)

    logits = date_transformer_forward(params, src, tgt)
    logits = jax.block_until_ready(logits)

    assert logits.shape == (batch, tgt_len, vocab_size), logits.shape
    assert bool(jnp.all(jnp.isfinite(logits)))
    print("KERNEL_OK")
</pallas_src>

<mosaic_0001>
module attributes {stable_mosaic.version = 11 : i64} {
  func.func @_mha_ln_kernel(%arg0: i32, %arg1: memref<1x8x32xf32, #tpu.memory_space<vmem>>, %arg2: memref<1x8x32xf32, #tpu.memory_space<vmem>>, %arg3: memref<32x32xf32, #tpu.memory_space<vmem>>, %arg4: memref<1x32xf32, #tpu.memory_space<vmem>>, %arg5: memref<32x64xf32, #tpu.memory_space<vmem>>, %arg6: memref<1x64xf32, #tpu.memory_space<vmem>>, %arg7: memref<32x32xf32, #tpu.memory_space<vmem>>, %arg8: memref<1x32xf32, #tpu.memory_space<vmem>>, %arg9: memref<1x32xf32, #tpu.memory_space<vmem>>, %arg10: memref<1x32xf32, #tpu.memory_space<vmem>>, %arg11: memref<1x8x32xf32, #tpu.memory_space<vmem>>) attributes {dimension_semantics = [#tpu.dimension_semantics<parallel>], iteration_bounds = array<i64: 2>, scalar_prefetch = 0 : i64, scratch_operands = 0 : i64, tpu.core_type = #tpu.core_type<tc>, window_params = [{transform_indices = @transform_0, window_bounds = array<i64: 1, 8, 32>}, {transform_indices = @transform_1, window_bounds = array<i64: 1, 8, 32>}, {pipeline_mode = #tpu.pipeline_mode<synchronous>, transform_indices = @transform_2, window_bounds = array<i64: 32, 32>}, {pipeline_mode = #tpu.pipeline_mode<synchronous>, transform_indices = @transform_3, window_bounds = array<i64: 1, 32>}, {pipeline_mode = #tpu.pipeline_mode<synchronous>, transform_indices = @transform_4, window_bounds = array<i64: 32, 64>}, {pipeline_mode = #tpu.pipeline_mode<synchronous>, transform_indices = @transform_5, window_bounds = array<i64: 1, 64>}, {pipeline_mode = #tpu.pipeline_mode<synchronous>, transform_indices = @transform_6, window_bounds = array<i64: 32, 32>}, {pipeline_mode = #tpu.pipeline_mode<synchronous>, transform_indices = @transform_7, window_bounds = array<i64: 1, 32>}, {pipeline_mode = #tpu.pipeline_mode<synchronous>, transform_indices = @transform_8, window_bounds = array<i64: 1, 32>}, {pipeline_mode = #tpu.pipeline_mode<synchronous>, transform_indices = @transform_9, window_bounds = array<i64: 1, 32>}, {transform_indices = @transform_10, window_bounds = array<i64: 1, 8, 32>}]} {
    %c0 = arith.constant 0 : index
    %c0_0 = arith.constant 0 : index
    %c0_1 = arith.constant 0 : index
    %0 = vector.load %arg1[%c0, %c0_0, %c0_1] : memref<1x8x32xf32, #tpu.memory_space<vmem>>, vector<1x8x32xf32>
    %1 = vector.shape_cast %0 : vector<1x8x32xf32> to vector<8x32xf32>
    %c0_2 = arith.constant 0 : index
    %c0_3 = arith.constant 0 : index
    %c0_4 = arith.constant 0 : index
    %2 = vector.load %arg2[%c0_2, %c0_3, %c0_4] : memref<1x8x32xf32, #tpu.memory_space<vmem>>, vector<1x8x32xf32>
    %3 = vector.shape_cast %2 : vector<1x8x32xf32> to vector<8x32xf32>
    %c0_5 = arith.constant 0 : index
    %c0_6 = arith.constant 0 : index
    %4 = vector.load %arg3[%c0_5, %c0_6] : memref<32x32xf32, #tpu.memory_space<vmem>>, vector<32x32xf32>
    %cst = arith.constant dense<0.000000e+00> : vector<8x32xf32>
    %5 = tpu.matmul %1, %4, %cst {dimension_numbers = #tpu.dot_dimension_numbers<[1], [0], [0], [1], [0, 0, 1, 1], [], []>} : vector<8x32xf32>, vector<32x32xf32>, vector<8x32xf32> -> vector<8x32xf32>
    %c0_7 = arith.constant 0 : index
    %c0_8 = arith.constant 0 : index
    %6 = vector.load %arg4[%c0_7, %c0_8] : memref<1x32xf32, #tpu.memory_space<vmem>>, vector<1x32xf32>
    %7 = vector.broadcast %6 : vector<1x32xf32> to vector<8x32xf32>
    %8 = arith.addf %5, %7 : vector<8x32xf32>
    %c0_9 = arith.constant 0 : index
    %c0_10 = arith.constant 0 : index
    %9 = vector.load %arg5[%c0_9, %c0_10] : memref<32x64xf32, #tpu.memory_space<vmem>>, vector<32x64xf32>
    %cst_11 = arith.constant dense<0.000000e+00> : vector<8x64xf32>
    %10 = tpu.matmul %3, %9, %cst_11 {dimension_numbers = #tpu.dot_dimension_numbers<[1], [0], [0], [1], [0, 0, 1, 1], [], []>} : vector<8x32xf32>, vector<32x64xf32>, vector<8x64xf32> -> vector<8x64xf32>
    %c0_12 = arith.constant 0 : index
    %c0_13 = arith.constant 0 : index
    %11 = vector.load %arg6[%c0_12, %c0_13] : memref<1x64xf32, #tpu.memory_space<vmem>>, vector<1x64xf32>
    %12 = vector.broadcast %11 : vector<1x64xf32> to vector<8x64xf32>
    %13 = arith.addf %10, %12 : vector<8x64xf32>
    %14 = vector.extract_strided_slice %13 {offsets = [0, 0], sizes = [8, 32], strides = [1, 1]} : vector<8x64xf32> to vector<8x32xf32>
    %15 = vector.extract_strided_slice %13 {offsets = [0, 32], sizes = [8, 32], strides = [1, 1]} : vector<8x64xf32> to vector<8x32xf32>
    %c0_14 = arith.constant 0 : index
    %c0_15 = arith.constant 0 : index
    %16 = vector.load %arg7[%c0_14, %c0_15] : memref<32x32xf32, #tpu.memory_space<vmem>>, vector<32x32xf32>
    %cst_16 = arith.constant 0.000000e+00 : f32
    %17 = vector.broadcast %cst_16 : f32 to vector<8x32xf32>
    %18 = vector.extract_strided_slice %8 {offsets = [0, 0], sizes = [8, 8], strides = [1, 1]} : vector<8x32xf32> to vector<8x8xf32>
    %19 = vector.extract_strided_slice %14 {offsets = [0, 0], sizes = [8, 8], strides = [1, 1]} : vector<8x32xf32> to vector<8x8xf32>
    %20 = vector.extract_strided_slice %15 {offsets = [0, 0], sizes = [8, 8], strides = [1, 1]} : vector<8x32xf32> to vector<8x8xf32>
    %21 = tpu.transpose %19, [1, 0] : vector<8x8xf32> -> vector<8x8xf32>
    %cst_17 = arith.constant dense<0.000000e+00> : vector<8x8xf32>
    %22 = tpu.matmul %18, %21, %cst_17 {dimension_numbers = #tpu.dot_dimension_numbers<[1], [0], [0], [1], [0, 0, 1, 1], [], []>} : vector<8x8xf32>, vector<8x8xf32>, vector<8x8xf32> -> vector<8x8xf32>
    %cst_18 = arith.constant 0.353553385 : f32
    %23 = vector.broadcast %cst_18 : f32 to vector<8x8xf32>
    %24 = arith.mulf %22, %23 : vector<8x8xf32>
    %cst_19 = arith.constant dense<0xFF800000> : vector<8xf32>
    %25 = vector.multi_reduction <maximumf>, %24, %cst_19 [1] : vector<8x8xf32> to vector<8xf32>
    %26 = vector.shape_cast %25 : vector<8xf32> to vector<8x1xf32>
    %27 = vector.broadcast %26 : vector<8x1xf32> to vector<8x8xf32>
    %28 = arith.subf %24, %27 : vector<8x8xf32>
    %29 = math.exp %28 : vector<8x8xf32>
    %cst_20 = arith.constant dense<0.000000e+00> : vector<8xf32>
    %30 = vector.multi_reduction <add>, %29, %cst_20 [1] : vector<8x8xf32> to vector<8xf32>
    %31 = vector.shape_cast %30 : vector<8xf32> to vector<8x1xf32>
    %32 = tpu.reciprocal %31 {approx = true} : vector<8x1xf32> -> vector<8x1xf32>
    %33 = vector.broadcast %32 : vector<8x1xf32> to vector<8x8xf32>
    %34 = arith.mulf %29, %33 : vector<8x8xf32>
    %cst_21 = arith.constant dense<0.000000e+00> : vector<8x8xf32>
    %35 = tpu.matmul %34, %20, %cst_21 {dimension_numbers = #tpu.dot_dimension_numbers<[1], [0], [0], [1], [0, 0, 1, 1], [], []>} : vector<8x8xf32>, vector<8x8xf32>, vector<8x8xf32> -> vector<8x8xf32>
    %36 = vector.extract_strided_slice %16 {offsets = [0, 0], sizes = [8, 32], strides = [1, 1]} : vector<32x32xf32> to vector<8x32xf32>
    %cst_22 = arith.constant dense<0.000000e+00> : vector<8x32xf32>
    %37 = tpu.matmul %35, %36, %cst_22 {dimension_numbers = #tpu.dot_dimension_numbers<[1], [0], [0], [1], [0, 0, 1, 1], [], []>} : vector<8x8xf32>, vector<8x32xf32>, vector<8x32xf32> -> vector<8x32xf32>
    %38 = arith.addf %17, %37 : vector<8x32xf32>
    %39 = vector.extract_strided_slice %8 {offsets = [0, 8], sizes = [8, 8], strides = [1, 1]} : vector<8x32xf32> to vector<8x8xf32>
    %40 = vector.extract_strided_slice %14 {offsets = [0, 8], sizes = [8, 8], strides = [1, 1]} : vector<8x32xf32> to vector<8x8xf32>
    %41 = vector.extract_strided_slice %15 {offsets = [0, 8], sizes = [8, 8], strides = [1, 1]} : vector<8x32xf32> to vector<8x8xf32>
    %42 = tpu.transpose %40, [1, 0] : vector<8x8xf32> -> vector<8x8xf32>
    %cst_23 = arith.constant dense<0.000000e+00> : vector<8x8xf32>
    %43 = tpu.matmul %39, %42, %cst_23 {dimension_numbers = #tpu.dot_dimension_numbers<[1], [0], [0], [1], [0, 0, 1, 1], [], []>} : vector<8x8xf32>, vector<8x8xf32>, vector<8x8xf32> -> vector<8x8xf32>
    %cst_24 = arith.constant 0.353553385 : f32
    %44 = vector.broadcast %cst_24 : f32 to vector<8x8xf32>
    %45 = arith.mulf %43, %44 : vector<8x8xf32>
    %cst_25 = arith.constant dense<0xFF800000> : vector<8xf32>
    %46 = vector.multi_reduction <maximumf>, %45, %cst_25 [1] : vector<8x8xf32> to vector<8xf32>
    %47 = vector.shape_cast %46 : vector<8xf32> to vector<8x1xf32>
    %48 = vector.broadcast %47 : vector<8x1xf32> to vector<8x8xf32>
    %49 = arith.subf %45, %48 : vector<8x8xf32>
    %50 = math.exp %49 : vector<8x8xf32>
    %cst_26 = arith.constant dense<0.000000e+00> : vector<8xf32>
    %51 = vector.multi_reduction <add>, %50, %cst_26 [1] : vector<8x8xf32> to vector<8xf32>
    %52 = vector.shape_cast %51 : vector<8xf32> to vector<8x1xf32>
    %53 = tpu.reciprocal %52 {approx = true} : vector<8x1xf32> -> vector<8x1xf32>
    %54 = vector.broadcast %53 : vector<8x1xf32> to vector<8x8xf32>
    %55 = arith.mulf %50, %54 : vector<8x8xf32>
    %cst_27 = arith.constant dense<0.000000e+00> : vector<8x8xf32>
    %56 = tpu.matmul %55, %41, %cst_27 {dimension_numbers = #tpu.dot_dimension_numbers<[1], [0], [0], [1], [0, 0, 1, 1], [], []>} : vector<8x8xf32>, vector<8x8xf32>, vector<8x8xf32> -> vector<8x8xf32>
    %57 = vector.extract_strided_slice %16 {offsets = [8, 0], sizes = [8, 32], strides = [1, 1]} : vector<32x32xf32> to vector<8x32xf32>
    %cst_28 = arith.constant dense<0.000000e+00> : vector<8x32xf32>
    %58 = tpu.matmul %56, %57, %cst_28 {dimension_numbers = #tpu.dot_dimension_numbers<[1], [0], [0], [1], [0, 0, 1, 1], [], []>} : vector<8x8xf32>, vector<8x32xf32>, vector<8x32xf32> -> vector<8x32xf32>
    %59 = arith.addf %38, %58 : vector<8x32xf32>
    %60 = vector.extract_strided_slice %8 {offsets = [0, 16], sizes = [8, 8], strides = [1, 1]} : vector<8x32xf32> to vector<8x8xf32>
    %61 = vector.extract_strided_slice %14 {offsets = [0, 16], sizes = [8, 8], strides = [1, 1]} : vector<8x32xf32> to vector<8x8xf32>
    %62 = vector.extract_strided_slice %15 {offsets = [0, 16], sizes = [8, 8], strides = [1, 1]} : vector<8x32xf32> to vector<8x8xf32>
    %63 = tpu.transpose %61, [1, 0] : vector<8x8xf32> -> vector<8x8xf32>
    %cst_29 = arith.constant dense<0.000000e+00> : vector<8x8xf32>
    %64 = tpu.matmul %60, %63, %cst_29 {dimension_numbers = #tpu.dot_dimension_numbers<[1], [0], [0], [1], [0, 0, 1, 1], [], []>} : vector<8x8xf32>, vector<8x8xf32>, vector<8x8xf32> -> vector<8x8xf32>
    %cst_30 = arith.constant 0.353553385 : f32
    %65 = vector.broadcast %cst_30 : f32 to vector<8x8xf32>
    %66 = arith.mulf %64, %65 : vector<8x8xf32>
    %cst_31 = arith.constant dense<0xFF800000> : vector<8xf32>
    %67 = vector.multi_reduction <maximumf>, %66, %cst_31 [1] : vector<8x8xf32> to vector<8xf32>
    %68 = vector.shape_cast %67 : vector<8xf32> to vector<8x1xf32>
    %69 = vector.broadcast %68 : vector<8x1xf32> to vector<8x8xf32>
    %70 = arith.subf %66, %69 : vector<8x8xf32>
    %71 = math.exp %70 : vector<8x8xf32>
    %cst_32 = arith.constant dense<0.000000e+00> : vector<8xf32>
    %72 = vector.multi_reduction <add>, %71, %cst_32 [1] : vector<8x8xf32> to vector<8xf32>
    %73 = vector.shape_cast %72 : vector<8xf32> to vector<8x1xf32>
    %74 = tpu.reciprocal %73 {approx = true} : vector<8x1xf32> -> vector<8x1xf32>
    %75 = vector.broadcast %74 : vector<8x1xf32> to vector<8x8xf32>
    %76 = arith.mulf %71, %75 : vector<8x8xf32>
    %cst_33 = arith.constant dense<0.000000e+00> : vector<8x8xf32>
    %77 = tpu.matmul %76, %62, %cst_33 {dimension_numbers = #tpu.dot_dimension_numbers<[1], [0], [0], [1], [0, 0, 1, 1], [], []>} : vector<8x8xf32>, vector<8x8xf32>, vector<8x8xf32> -> vector<8x8xf32>
    %78 = vector.extract_strided_slice %16 {offsets = [16, 0], sizes = [8, 32], strides = [1, 1]} : vector<32x32xf32> to vector<8x32xf32>
    %cst_34 = arith.constant dense<0.000000e+00> : vector<8x32xf32>
    %79 = tpu.matmul %77, %78, %cst_34 {dimension_numbers = #tpu.dot_dimension_numbers<[1], [0], [0], [1], [0, 0, 1, 1], [], []>} : vector<8x8xf32>, vector<8x32xf32>, vector<8x32xf32> -> vector<8x32xf32>
    %80 = arith.addf %59, %79 : vector<8x32xf32>
    %81 = vector.extract_strided_slice %8 {offsets = [0, 24], sizes = [8, 8], strides = [1, 1]} : vector<8x32xf32> to vector<8x8xf32>
    %82 = vector.extract_strided_slice %14 {offsets = [0, 24], sizes = [8, 8], strides = [1, 1]} : vector<8x32xf32> to vector<8x8xf32>
    %83 = vector.extract_strided_slice %15 {offsets = [0, 24], sizes = [8, 8], strides = [1, 1]} : vector<8x32xf32> to vector<8x8xf32>
    %84 = tpu.transpose %82, [1, 0] : vector<8x8xf32> -> vector<8x8xf32>
    %cst_35 = arith.constant dense<0.000000e+00> : vector<8x8xf32>
    %85 = tpu.matmul %81, %84, %cst_35 {dimension_numbers = #tpu.dot_dimension_numbers<[1], [0], [0], [1], [0, 0, 1, 1], [], []>} : vector<8x8xf32>, vector<8x8xf32>, vector<8x8xf32> -> vector<8x8xf32>
    %cst_36 = arith.constant 0.353553385 : f32
    %86 = vector.broadcast %cst_36 : f32 to vector<8x8xf32>
    %87 = arith.mulf %85, %86 : vector<8x8xf32>
    %cst_37 = arith.constant dense<0xFF800000> : vector<8xf32>
    %88 = vector.multi_reduction <maximumf>, %87, %cst_37 [1] : vector<8x8xf32> to vector<8xf32>
    %89 = vector.shape_cast %88 : vector<8xf32> to vector<8x1xf32>
    %90 = vector.broadcast %89 : vector<8x1xf32> to vector<8x8xf32>
    %91 = arith.subf %87, %90 : vector<8x8xf32>
    %92 = math.exp %91 : vector<8x8xf32>
    %cst_38 = arith.constant dense<0.000000e+00> : vector<8xf32>
    %93 = vector.multi_reduction <add>, %92, %cst_38 [1] : vector<8x8xf32> to vector<8xf32>
    %94 = vector.shape_cast %93 : vector<8xf32> to vector<8x1xf32>
    %95 = tpu.reciprocal %94 {approx = true} : vector<8x1xf32> -> vector<8x1xf32>
    %96 = vector.broadcast %95 : vector<8x1xf32> to vector<8x8xf32>
    %97 = arith.mulf %92, %96 : vector<8x8xf32>
    %cst_39 = arith.constant dense<0.000000e+00> : vector<8x8xf32>
    %98 = tpu.matmul %97, %83, %cst_39 {dimension_numbers = #tpu.dot_dimension_numbers<[1], [0], [0], [1], [0, 0, 1, 1], [], []>} : vector<8x8xf32>, vector<8x8xf32>, vector<8x8xf32> -> vector<8x8xf32>
    %99 = vector.extract_strided_slice %16 {offsets = [24, 0], sizes = [8, 32], strides = [1, 1]} : vector<32x32xf32> to vector<8x32xf32>
    %cst_40 = arith.constant dense<0.000000e+00> : vector<8x32xf32>
    %100 = tpu.matmul %98, %99, %cst_40 {dimension_numbers = #tpu.dot_dimension_numbers<[1], [0], [0], [1], [0, 0, 1, 1], [], []>} : vector<8x8xf32>, vector<8x32xf32>, vector<8x32xf32> -> vector<8x32xf32>
    %101 = arith.addf %80, %100 : vector<8x32xf32>
    %c0_41 = arith.constant 0 : index
    %c0_42 = arith.constant 0 : index
    %102 = vector.load %arg8[%c0_41, %c0_42] : memref<1x32xf32, #tpu.memory_space<vmem>>, vector<1x32xf32>
    %103 = vector.broadcast %102 : vector<1x32xf32> to vector<8x32xf32>
    %104 = arith.addf %101, %103 : vector<8x32xf32>
    %105 = arith.addf %104, %1 : vector<8x32xf32>
    %c0_43 = arith.constant 0 : index
    %c0_44 = arith.constant 0 : index
    %106 = vector.load %arg9[%c0_43, %c0_44] : memref<1x32xf32, #tpu.memory_space<vmem>>, vector<1x32xf32>
    %c0_45 = arith.constant 0 : index
    %c0_46 = arith.constant 0 : index
    %107 = vector.load %arg10[%c0_45, %c0_46] : memref<1x32xf32, #tpu.memory_space<vmem>>, vector<1x32xf32>
    %cst_47 = arith.constant dense<0.000000e+00> : vector<8xf32>
    %108 = vector.multi_reduction <add>, %105, %cst_47 [1] : vector<8x32xf32> to vector<8xf32>
    %109 = vector.shape_cast %108 : vector<8xf32> to vector<8x1xf32>
    %cst_48 = arith.constant 3.200000e+01 : f32
    %110 = vector.broadcast %cst_48 : f32 to vector<8x1xf32>
    %111 = arith.divf %109, %110 : vector<8x1xf32>
    %112 = vector.broadcast %111 : vector<8x1xf32> to vector<8x32xf32>
    %113 = arith.subf %105, %112 : vector<8x32xf32>
    %114 = arith.mulf %113, %113 : vector<8x32xf32>
    %cst_49 = arith.constant dense<0.000000e+00> : vector<8xf32>
    %115 = vector.multi_reduction <add>, %114, %cst_49 [1] : vector<8x32xf32> to vector<8xf32>
    %116 = vector.shape_cast %115 : vector<8xf32> to vector<8x1xf32>
    %cst_50 = arith.constant 3.200000e+01 : f32
    %117 = vector.broadcast %cst_50 : f32 to vector<8x1xf32>
    %118 = arith.divf %116, %117 : vector<8x1xf32>
    %119 = vector.broadcast %111 : vector<8x1xf32> to vector<8x32xf32>
    %120 = arith.subf %105, %119 : vector<8x32xf32>
    %cst_51 = arith.constant 9.99999974E-6 : f32
    %121 = vector.broadcast %cst_51 : f32 to vector<8x1xf32>
    %122 = arith.addf %118, %121 : vector<8x1xf32>
    %123 = math.rsqrt %122 : vector<8x1xf32>
    %124 = vector.broadcast %123 : vector<8x1xf32> to vector<8x32xf32>
    %125 = arith.mulf %120, %124 : vector<8x32xf32>
    %126 = vector.broadcast %106 : vector<1x32xf32> to vector<8x32xf32>
    %127 = arith.mulf %125, %126 : vector<8x32xf32>
    %128 = vector.broadcast %107 : vector<1x32xf32> to vector<8x32xf32>
    %129 = arith.addf %127, %128 : vector<8x32xf32>
    %c0_52 = arith.constant 0 : index
    %c0_53 = arith.constant 0 : index
    %c0_54 = arith.constant 0 : index
    %130 = vector.load %arg11[%c0_52, %c0_53, %c0_54] : memref<1x8x32xf32, #tpu.memory_space<vmem>>, vector<1x8x32xf32>
    %131 = vector.shape_cast %130 : vector<1x8x32xf32> to vector<8x32xf32>
    %132 = vector.shape_cast %129 : vector<8x32xf32> to vector<1x8x32xf32>
    tpu.vector_store %arg11[%c0_52, %c0_53, %c0_54], %132 {strides = array<i32>} : memref<1x8x32xf32, #tpu.memory_space<vmem>>, vector<1x8x32xf32>,
    return
  }
  func.func @transform_0(%arg0: i32) -> (i32, i32, i32) {
    %c0_i32 = arith.constant 0 : i32
    %c0_i32_0 = arith.constant 0 : i32
    %c0_i32_1 = arith.constant 0 : i32
    return %arg0, %c0_i32, %c0_i32_0 : i32, i32, i32
  }
  func.func @transform_1(%arg0: i32) -> (i32, i32, i32) {
    %c0_i32 = arith.constant 0 : i32
    %c0_i32_0 = arith.constant 0 : i32
    %c0_i32_1 = arith.constant 0 : i32
    return %arg0, %c0_i32, %c0_i32_0 : i32, i32, i32
  }
  func.func @transform_2(%arg0: i32) -> (i32, i32) {
    %c0_i32 = arith.constant 0 : i32
    %c0_i32_0 = arith.constant 0 : i32
    %c0_i32_1 = arith.constant 0 : i32
    return %c0_i32, %c0_i32_0 : i32, i32
  }
  func.func @transform_3(%arg0: i32) -> (i32, i32) {
    %c0_i32 = arith.constant 0 : i32
    %c0_i32_0 = arith.constant 0 : i32
    %c0_i32_1 = arith.constant 0 : i32
    return %c0_i32, %c0_i32_0 : i32, i32
  }
  func.func @transform_4(%arg0: i32) -> (i32, i32) {
    %c0_i32 = arith.constant 0 : i32
    %c0_i32_0 = arith.constant 0 : i32
    %c0_i32_1 = arith.constant 0 : i32
    return %c0_i32, %c0_i32_0 : i32, i32
  }
  func.func @transform_5(%arg0: i32) -> (i32, i32) {
    %c0_i32 = arith.constant 0 : i32
    %c0_i32_0 = arith.constant 0 : i32
    %c0_i32_1 = arith.constant 0 : i32
    return %c0_i32, %c0_i32_0 : i32, i32
  }
  func.func @transform_6(%arg0: i32) -> (i32, i32) {
    %c0_i32 = arith.constant 0 : i32
    %c0_i32_0 = arith.constant 0 : i32
    %c0_i32_1 = arith.constant 0 : i32
    return %c0_i32, %c0_i32_0 : i32, i32
  }
  func.func @transform_7(%arg0: i32) -> (i32, i32) {
    %c0_i32 = arith.constant 0 : i32
    %c0_i32_0 = arith.constant 0 : i32
    %c0_i32_1 = arith.constant 0 : i32
    return %c0_i32, %c0_i32_0 : i32, i32
  }
  func.func @transform_8(%arg0: i32) -> (i32, i32) {
    %c0_i32 = arith.constant 0 : i32
    %c0_i32_0 = arith.constant 0 : i32
    %c0_i32_1 = arith.constant 0 : i32
    return %c0_i32, %c0_i32_0 : i32, i32
  }
  func.func @transform_9(%arg0: i32) -> (i32, i32) {
    %c0_i32 = arith.constant 0 : i32
    %c0_i32_0 = arith.constant 0 : i32
    %c0_i32_1 = arith.constant 0 : i32
    return %c0_i32, %c0_i32_0 : i32, i32
  }
  func.func @transform_10(%arg0: i32) -> (i32, i32, i32) {
    %c0_i32 = arith.constant 0 : i32
    %c0_i32_0 = arith.constant 0 : i32
    %c0_i32_1 = arith.constant 0 : i32
    return %arg0, %c0_i32, %c0_i32_0 : i32, i32, i32
  }
}

</mosaic_0001>

<bundles_post_ra>
// kernel: tpu_custom_call.1
= control target key start
LH: loop header
LB: loop body
LE: loop exit
PB: predicated region body
PF: predicated region fallthrough
CT: control target
= control target key end

     0   :  { %s1779_s0 = inlined_call_operand.hbm [shape: f32[2,8,32], index: 0, kind: input, shape index: {}]   ;;  %s1780_s1 = inlined_call_operand.hbm [shape: f32[2,8,32], index: 1, kind: input, shape index: {}]   ;;  %s1781_s2 = inlined_call_operand.hbm [shape: f32[32,32], index: 2, kind: input, shape index: {}]   ;;  %s1782_s3 = inlined_call_operand.vmem [shape: f32[1,32], index: 3, kind: input, shape index: {}]   ;;  %s1783_s4 = inlined_call_operand.hbm [shape: f32[32,64], index: 4, kind: input, shape index: {}]   ;;  %s1784_s5 = inlined_call_operand.vmem [shape: f32[1,64], index: 5, kind: input, shape index: {}]   ;;  %s1785_s6 = inlined_call_operand.hbm [shape: f32[32,32], index: 6, kind: input, shape index: {}]   ;;  %s1786_s7 = inlined_call_operand.vmem [shape: f32[1,32], index: 7, kind: input, shape index: {}]   ;;  %s1787_s8 = inlined_call_operand.vmem [shape: f32[1,32], index: 8, kind: input, shape index: {}]   ;;  %s1788_s9 = inlined_call_operand.vmem [shape: f32[1,32], index: 9, kind: input, shape index: {}]   ;;  %s1789_s10 = inlined_call_operand.hbm [shape: f32[2,8,32], index: 10, kind: output, shape index: {}]  }
   0x1   :  { %1796 = sst [smem:[#allocation23_spill]] %s1781_s2 }
   0x2   :  { %1797 = sst [smem:[#allocation24_spill]] %s1783_s4 }
   0x3   :  { %1798 = sst [smem:[#allocation25_spill]] %s1785_s6 }
   0x4   :  { %15 = vsyncpa [#allocation3], 0 }
   0x5   :  { %17 = vsyncpa [#allocation3 + $0x1], 0 }
   0x6   :  { %18 = vsyncpa [#allocation6], 0 }
   0x7   :  { %20 = vsyncpa [#allocation6 + $0x1], 0 }
   0x8   :  { %21 = vsyncpa [#allocation9], 0 }
   0x9   :  { %22 = vsyncpa [#allocation4], 0 }
   0xa   :  { %24 = vsyncpa [#allocation4 + $0x1], 0  ;;  %s1528_s13 = smov 0   ;;  %s1530_s14 = smov 0  }
   0xb   :  { %s1532_s15 = smov 0   ;;  %s1534_s16 = smov 0  }
   0xc LB: > { %1799 = sst [smem:[#allocation17_spill]] %s1446_s13  ;;  %s1552_s20 = sadd.s32 4294967295, %s1458_s16   ;;  %s1458_s16 = sphi %s1534_s16, %s1819_s16   ;;  %s1454_s15 = sphi %s1532_s15, %s1821_s15   ;;  %s1450_s14 = sphi %s1530_s14, %s1823_s14   ;;  %s1446_s13 = sphi %s1528_s13, %s1822_s13  }
   0xd   : > { %1800 = sst [smem:[#allocation18_spill]] %s1454_s15  ;;  %p1075_p0 = scmp.ge.s32.totalorder %s1458_s16, 1 }
   0xe   : > { %1801 = sst [smem:[#allocation19_spill]] %s1458_s16  ;;  %p51_p1 = scmp.eq.s32.totalorder %s1552_s20, 0 }
   0xf   : > { %s1802_s2 = sld [smem:[#allocation23_spill]]  ;;  %p281_p2 = scmp.lt.s32.totalorder %s1458_s16, 3 }
  0x10   : > { %s1460_s22 = smov [#allocation7]   ;;  %s1804_s4 = sld [smem:[#allocation24_spill]] }
  0x11   : > { %p1557_p3 = pnand %p1075_p0, %p281_p2  ;;  %s294_s23 = sshll.u32 %s1460_s22, 4  ;;  %s295_s23 = int_to_ptr.vmem [resolvable:$true] %s294_s23 }
  0x12   : > { %s1806_s6 = sld [smem:[#allocation25_spill]]  ;;  %s1461_s11 = smov [#allocation8]  }
  0x13   : > { %p1131_p4 = pneg %p1557_p3  ;;  %s311_s12 = sshll.u32 %s1461_s11, 4  ;;  %s312_s12 = int_to_ptr.vmem [resolvable:$true] %s311_s12 }
  0x14   : > { %s1462_s17 = smov 128   ;;  %s1463_s18 = smov 8  }
  0x15   : > { %s292_s19 = sshll.u32 %s1802_s2, 4  ;;  %p1569_p6 = pnand %p1131_p4, %p51_p1  ;;  %s293_s19 = int_to_ptr.hbm [resolvable:$true] %s292_s19 }
  0x16   : > { %s309_s26 = sshll.u32 %s1804_s4, 4  ;;  %s1464_s22 = smov [#allocation10]   ;;  %s310_s26 = int_to_ptr.hbm [resolvable:$true] %s309_s26 }
  0x17   : > { %1134 = dma.hbm_to_vmem [thread:$0]  (!%p1569_p6), %s293_s19, 512, %s295_s23, [#allocation6], %s1462_s17, %s1462_s17, %s1463_s18  }
  0x18   : > { %s326_s30 = sshll.u32 %s1806_s6, 4  ;;  %s328_s24 = sshll.u32 %s1464_s22, 4  ;;  %s327_s30 = int_to_ptr.hbm [resolvable:$true] %s326_s30  ;;  %s329_s24 = int_to_ptr.vmem [resolvable:$true] %s328_s24 }
  0x19   : > { %1137 = dma.hbm_to_vmem [thread:$0]  (!%p1569_p6), %s310_s26, 512, %s312_s12, [#allocation9], %s1462_s17, %s1462_s17, %s1463_s18  }
  0x1a   : > { %1140 = dma.hbm_to_vmem [thread:$0]  (!%p1569_p6), %s327_s30, 512, %s329_s24, [#allocation9], %s1462_s17, %s1462_s17, %s1463_s18  }
  0x1b   : > { %s1074_s25 = sadd.s32 4294967294, %s1458_s16   ;;  %s1584_s28 = sadd.s32 1, %s1458_s16  }
  0x1c   : > { %1807 = sst [smem:[#allocation20_spill]] %s1584_s28  ;;  %s37_s29 = sadd.s32 1, %s1454_s15 }
  0x1d   : > { %s34_s19 = ssub.s32 %s1458_s16, %s1584_s28  ;;  %p44_p7 = scmp.ne.s32.totalorder %s1454_s15, %s1450_s14 }
  0x1e   : > { %p35_p8 = scmp.eq.s32.totalorder %s34_s19, 0  ;;  %p45_p9 = scmp.eq.s32.totalorder %s1458_s16, 0 }
  0x1f   : > { %p50_p10 = scmp.ne.s32.totalorder %s1450_s14, %s1446_s13  ;;  %p268_p11 = scmp.eq.s32.totalorder %s1552_s20, 1 }
  0x20   : > { %s1596_s23 = scalar_select %p35_p8, %s1454_s15, %s37_s29  }
  0x21   : > { %p1598_p12 = por %p45_p9, %p44_p7  ;;  %p1604_p13 = por %p51_p1, %p50_p10 }
  0x22   : > { %1808 = sst [smem:[#allocation21_spill]] %s1596_s23  ;;  %p1608_p0 = por %p268_p11, %p44_p7 }
  0x23   : > { %p274_p2 = scmp.eq.s32.totalorder %s1074_s25, 1  ;;  %p1155_p4 = scmp.lt.s32.totalorder %s1458_s16, 2 }
  0x24   : > { %s351_s11 = sand.u32 1, %s1454_s15   ;;  %s1081_s18 = sshll.u32 %s1458_s16, 3 }
  0x25   : > { %p1614_p6 = por %p274_p2, %p50_p10  ;;  %s1080_s17 = sshll.u32 %s351_s11, 3 }
  0x26   : > { %s359_s29 = scalar_lea.hbm %s1779_s0, %s1081_s18  ;;  %s355_s2 = scalar_lea.vmem [#allocation2], %s1080_s17 }
  0x27   : > { %s1812_s12 = scalar_select %p1614_p6, 1, 0 }
  0x28   : > { %s361_s19 = sshll.u32 %s359_s29, 4  ;;  %s363_s4 = sshll.u32 %s355_s2, 4  ;;  %s362_s19 = int_to_ptr.hbm [resolvable:$true] %s361_s19  ;;  %s364_s4 = int_to_ptr.vmem [resolvable:$true] %s363_s4 }
  0x29   : > { %1813 = sst [smem:[#allocation22_spill]] %s1812_s12  ;;  %p1624_p7 = pnand %p1155_p4, %p1598_p12 }
  0x2a   : > { %s378_s15 = scalar_lea.hbm %s1780_s1, %s1081_s18  ;;  %s370_s28 = sand.u32 1, %s1458_s16  }
  0x2b   : > { %s352_s12 = scalar_lea.sflag [#allocation3], %s351_s11  ;;  %s1320_s22 = sshra.s32 %s362_s19, 4  ;;  %s1321_s22 = int_to_ptr.hbm [resolvable:$true] %s1320_s22 }
  0x2c   : > { %s1322_s24 = scalar_lea.hbm %s1321_s22, 8  ;;  %p1324_p9 = pneg %p1624_p7 }
  0x2d   : > { %p1323_p8 = scmp.ne.s32.totalorder %s1321_s22, %s1322_s24  ;;  %s1327_s29 = scalar_lea.hbm %s1779_s0, 16 }
  0x2e   : > { %p1328_p12 = scmp.lt.s32.totalorder %s1321_s22, %s1779_s0  ;;  %p1329_p2 = scmp.lt.s32.totalorder %s1327_s29, %s1322_s24 }
  0x2f   : > { %p1325_p10 = pnand %p1324_p9, %p1323_p8 }
  0x30   : > { %p1330_p4 = por %p1329_p2, %p1328_p12 }
  0x31   : > { %p1326_p11 = pneg %p1325_p10 }
  0x33   : > { %p1331_p5 = pnand %p1330_p4, %p1326_p11 }
  0x35   : > { %1334 = shalt.err (!%p1331_p5)
}
  0x36   : > { %1144 = dma.hbm_to_vmem [thread:$0]  (!%p1624_p7), %s362_s19, 128, %s364_s4, %s352_s12  }
  0x37   : > { %s380_s11 = sshll.u32 %s378_s15, 4  ;;  %s374_s18 = scalar_lea.vmem [#allocation5], %s1080_s17  ;;  %s381_s11 = int_to_ptr.hbm [resolvable:$true] %s380_s11 }
  0x38   : > { %s382_s16 = sshll.u32 %s374_s18, 4  ;;  %s371_s13 = scalar_lea.sflag [#allocation6], %s370_s28  ;;  %s383_s16 = int_to_ptr.vmem [resolvable:$true] %s382_s16 }
  0x39   : > { %s1350_s2 = sshra.s32 %s381_s11, 4  ;;  %s1357_s29 = scalar_lea.hbm %s1780_s1, 16  ;;  %s1351_s2 = int_to_ptr.hbm [resolvable:$true] %s1350_s2 }
  0x3a   : > { %s1352_s26 = scalar_lea.hbm %s1351_s2, 8  ;;  %p1358_p5 = scmp.lt.s32.totalorder %s1351_s2, %s1780_s1 }
  0x3b   : > { %p1353_p8 = scmp.ne.s32.totalorder %s1351_s2, %s1352_s26  ;;  %p1359_p11 = scmp.lt.s32.totalorder %s1357_s29, %s1352_s26 }
  0x3d   : > { %p1355_p10 = pnand %p1353_p8, %p1324_p9  ;;  %p1360_p2 = por %p1359_p11, %p1358_p5 }
  0x3f   : > { %p1356_p12 = pneg %p1355_p10 }
  0x41   : > { %p1361_p4 = pnand %p1360_p2, %p1356_p12 }
  0x43   : > { %1364 = shalt.err (!%p1361_p4)
}
  0x44   : > { %1147 = dma.hbm_to_vmem [thread:$0]  (!%p1624_p7), %s381_s11, 128, %s383_s16, %s371_s13  }
  0x45   : > { %391 = sbr.rel (%p1557_p3) target bundleno = 1693 (0x69d), region = 60  ;;  %s1659_s15 = sand.u32 (!%p1557_p3), 1, %s1450_s14  }
  0x46   : > { %s1662_s28 = sshll.u32 (!%p1557_p3), %s1659_s15, 3  ;;  %s394_s12 = scalar_lea.sflag (!%p1557_p3), [#allocation3], %s1659_s15 }
  0x47   : > { %s397_s17 = scalar_lea.vmem (!%p1557_p3), [#allocation2], %s1662_s28 }
  0x4a   : > { %1425 = dma.done.wait (%p1604_p13), %s394_s12, 128  }
  0x4b   : > { %1427 = vsyncadd (%p1604_p13), %s394_s12, 4294967168  ;;  %s403_s13 = sand.u32 1, %s1552_s20   ;;  %s407_s21 = scalar_lea.vmem [#allocation5], %s1662_s28 }
  0x4c   : > { %s404_s16 = scalar_lea.sflag [#allocation6], %s403_s13 }
  0x4d   : > { %1429 = dma.done.wait (%p1604_p13), %s404_s16, 128  }
  0x4e   : > { %1431 = vsyncadd (%p1604_p13), %s404_s16, 4294967168 }
  0x4f   : > { %1433 = dma.done.wait (%p51_p1), [#allocation6], 512  }
  0x50   : > { %1435 = vsyncadd (%p51_p1), [#allocation6], 4294966784 }
  0x51   : > { %1437 = dma.done.wait (%p51_p1), [#allocation9], 1024  }
  0x52   : > { %1439 = vsyncadd (%p51_p1), [#allocation9], 4294966272  ;;  %v470_v0 = vld [vmem:[#allocation7 + $0x18] sm:$0xff]  ;;  %v469_v2 = vld [vmem:[#allocation7 + $0x10] sm:$0xff]  ;;  %vm475_vm0 = vcmask 261120   ;;  %vm534_vm1 = vcmask 64512  }
  0x53   : > { %v502_v1 = vld [vmem:[#allocation8 + $0x18] sm:$0xff]  ;;  %491 = vmatpush.msra.mxu0 %v470_v0  ;;  %v501_v3 = vld [vmem:[#allocation8 + $0x10] sm:$0xff]  ;;  %v468_v4 = vld [vmem:[#allocation7 + $0x8] sm:$0xff]  ;;  %s1465_s11 = smov 96   ;;  %s1466_s18 = smov 120  }
  0x54   : > { %522 = vmatpush.msra.mxu1 %v502_v1  ;;  %v500_v5 = vld [vmem:[#allocation8 + $0x8] sm:$0xff]  ;;  %v467_v6 = vld [vmem:[#allocation7] sm:$0xff]  ;;  %v466_v9 = vld [vmem:[%s407_s21] sm:$0xff]  ;;  %s1467_s2 = smov 112   ;;  %s1468_s26 = smov 104  }
  0x55   : > { %492 = vmatpush.msra.mxu0 %v469_v2  ;;  %v499_v7 = vld [vmem:[#allocation8] sm:$0xff]  ;;  %s1469_s22 = smov 72   ;;  %s1470_s24 = smov 80  }
  0x56   : > { %523 = vmatpush.msra.mxu1 %v501_v3  ;;  %v1684_v8 = vld [vmem:[%s397_s17] sm:$0xff]  ;;  %s1471_s29 = smov 88   ;;  %s1110_s12 = sshll.u32 %s1552_s20, 3 }
  0x57   : > { %493 = vmatpush.msra.mxu0 %v468_v4  ;;  %v1205_v10 = vld [vmem:[%s1782_s3] ss:$0 sm:$0xff]  ;;  %s948_s27 = scalar_lea.hbm %s1789_s10, %s1110_s12  ;;  %s464_s20 = scalar_lea.vmem [#allocation11], %s1662_s28 }
  0x58   : > { %524 = vmatpush.msra.mxu1 %v500_v5  ;;  %v1206_v11 = vld [vmem:[%s1784_s5] ss:$0 sm:$0xff]  ;;  %s950_s23 = sshll.u32 %s464_s20, 4  ;;  %s1400_s28 = scalar_lea.hbm %s1789_s10, 16  ;;  %s951_s23 = int_to_ptr.vmem [resolvable:$true] %s950_s23 }
  0x59   : > { %494 = vmatpush.msra.mxu0 %v467_v6  ;;  %v530_v26 = vld [vmem:[#allocation10] sm:$0xff] }
  0x5a   : > { %525 = vmatpush.msra.mxu1 %v499_v7  ;;  %1091 = vmatmul.msk.f32.vlgmr.msra.gmra.mxu0 %vm475_vm0, %v1684_v8 }
  0x5b   : > { %1092 = vmatmul.msk.f32.vlgmr.msra.gmra.mxu1 %vm475_vm0, %v466_v9 }
  0x5c   : > { %706 = vmatpush.msrb.mxu1 %v530_v26  ;;  %v1472_v26 = vmov 32.0  }
  0xd7   : > { %v496_v12 = vpop.f32.mrf.mxu0 }
  0xd8   : > { %v527_v13 = vpop.f32.mrf.mxu1  ;;  %v497_v14 = vadd.f32 %v1205_v10, %v496_v12  ;;  %v533_v10 = vld [vmem:[#allocation10 + $0x18] sm:$0xff]  ;;  %v532_v12 = vld [vmem:[#allocation10 + $0x10] sm:$0xff] }
  0xd9   : > { %v1695_v15 = vadd.f32 %v1206_v11, %v527_v13  ;;  %v531_v11 = vld [vmem:[#allocation10 + $0x8] sm:$0xff] }
  0xda   : > { %599 = vrot.lane.b32.xlu2 %v497_v14, %s1466_s18  ;;  %683 = vmatpush.msrb.mxu0 %v531_v11 }
  0xdb   : > { %573 = vrot.lane.b32.xlu1 %v1695_v15, %s1465_s11  ;;  %1093 = vmatpush.xpose.msk.msra.mxu2 %vm534_vm1, %v1695_v15  ;;  %s952_s11 = sshll.u32 %s948_s27, 4  ;;  %s953_s11 = int_to_ptr.hbm [resolvable:$true] %s952_s11 }
  0xdc   : > { %795 = vmatpush.msra.mxu0 %v532_v12 }
  0xde   : > { %1094 = vmatmul.msk.f32.vlgmr.msra.gmra.mxu2 %vm534_vm1, %v497_v14 }
  0xe2   : > { %713 = vrot.lane.b32.xlu2 %v1695_v15, %s1467_s2 }
  0xe3   : > { %601 = vrot.lane.b32.xlu1 %v1695_v15, %s1466_s18  ;;  %s938_s18 = scalar_lea.sflag [#allocation4], %s1659_s15 }
  0xea   : > { %801 = vrot.lane.b32.xlu2 %v497_v14, %s1468_s26 }
  0xeb   : > { %711 = vrot.lane.b32.xlu1 %v497_v14, %s1467_s2  ;;  %s1394_s2 = sshra.s32 %s953_s11, 4  ;;  %s1395_s2 = int_to_ptr.hbm [resolvable:$true] %s1394_s2 }
  0xec   : > { %p1401_p7 = scmp.lt.s32.totalorder %s1395_s2, %s1789_s10 }
 0x134   : > { %v600_v27 = vpop.permute.xlu2 %599 }
 0x13c   : > { %v714_v31 = vpop.permute.xlu2 %713 }
 0x144   : > { %v802_v35 = vpop.permute.xlu2 %801 }
 0x14d   : > { %v574_v16 = vpop.permute.xlu1 %573 }
 0x14e   : > { %594 = vmatpush.msra.mxu3 %v574_v16 }
 0x155   : > { %v602_v17 = vpop.permute.xlu1 %601 }
 0x156   : > { %1096 = vmatpush.xpose.msk.msrb.mxu3 %vm534_vm1, %v602_v17 }
 0x15d   : > { %v712_v33 = vpop.permute.xlu1 %711 }
 0x161   : > { %v558_v18 = vpop.f32.mrf.mxu2 }
 0x162   : > { %v561_v19 = vmul.f32 0.35355338, %v558_v18 }
 0x164   : > { %v562_v20 = vsel %vm534_vm1, %v561_v19, -inf }
 0x165   : > { %563 = vmax.xlane.f32.xlu0 %v562_v20  ;;  %v1207_v20 = vld [vmem:[%s1786_s7] ss:$0 sm:$0xff] }
 0x1d8   : > { %v564_v21 = vpop.xlane.xlu0 %563 }
 0x1d9   : > { %v565_v22 = vsub.f32 %v561_v19, %v564_v21 }
 0x1db   : > { %v566_v23 = vmul.f32 1.442695, %v565_v22 }
 0x1dd   : > { %1210 = vpow2.f32 %v566_v23 }
 0x1e3   : > { %v1211_v24 = vpop.eup %1210 }
 0x1e4   : > { %v568_v25 = vsel %vm534_vm1, %v1211_v24, 0.0 }
 0x1e5   : > { %569 = vadd.xlane.f32.xlu0 %v568_v25 }
 0x1f9   : > { %803 = vrot.lane.b32.xlu0 %v1695_v15, %s1468_s26  ;;  %s1396_s26 = scalar_lea.hbm %s1395_s2, 8 }
 0x1fa   : > { %p1397_p1 = scmp.ne.s32.totalorder %s1395_s2, %s1396_s26  ;;  %p1402_p9 = scmp.lt.s32.totalorder %s1400_s28, %s1396_s26 }
 0x1fc   : > { %p1398_p3 = pnand %p1397_p1, %p1608_p0  ;;  %p1403_p8 = por %p1402_p9, %p1401_p7 }
 0x1fe   : > { %p1399_p13 = pneg %p1398_p3 }
 0x200   : > { %p1404_p10 = pnand %p1403_p8, %p1399_p13 }
 0x258   : > { %v570_v28 = vpop.xlane.xlu0 %569 }
 0x259   : > { %1212 = vrcp.f32 %v570_v28 }
 0x25f   : > { %v1213_v29 = vpop.eup %1212 }
 0x260   : > { %v572_v30 = vmul.f32 %v1213_v29, %v1211_v24 }
 0x262   : > { %1095 = vmatmul.msk.f32.vlgmr.msra.gmra.mxu3 %vm534_vm1, %v572_v30 }
 0x263   : > { %1101 = vmatpush.xpose.msk.msra.mxu3 %vm534_vm1, %v714_v31 }
 0x26a   : > { %1097 = vmatmul.msk.f32.vlgmr.msrb.gmra.mxu3 %vm534_vm1, %v600_v27 }
 0x26b   : > { %v804_v32 = vpop.permute.xlu0 %803 }
 0x26c   : > { %1105 = vmatpush.xpose.msk.msra.mxu1 %vm534_vm1, %v804_v32 }
 0x272   : > { %1102 = vmatmul.msk.f32.vlgmr.msra.gmra.mxu3 %vm534_vm1, %v712_v33 }
 0x2e5   : > { %v596_v34 = vpop.f32.mrf.mxu3 }
 0x2e6   : > { %1100 = vmatmul.msk.f32.vlgmr.msrb.gmra.mxu1 %vm534_vm1, %v596_v34 }
 0x2ed   : > { %v624_v36 = vpop.f32.mrf.mxu3 }
 0x2ee   : > { %v627_v37 = vmul.f32 0.35355338, %v624_v36  ;;  %1106 = vmatmul.msk.f32.vlgmr.msra.gmra.mxu1 %vm534_vm1, %v802_v35 }
 0x2f0   : > { %v628_v38 = vsel %vm534_vm1, %v627_v37, -inf }
 0x2f1   : > { %629 = vmax.xlane.f32.xlu1 %v628_v38 }
 0x2f5   : > { %v736_v39 = vpop.f32.mrf.mxu3 }
 0x2f6   : > { %v739_v40 = vmul.f32 0.35355338, %v736_v39 }
 0x2f8   : > { %v740_v41 = vsel %vm534_vm1, %v739_v40, -inf }
 0x2f9   : > { %741 = vmax.xlane.f32.xlu0 %v740_v41 }
 0x30d   : > { %841 = vrot.lane.b32.xlu0 %v1695_v15, %s1469_s22 }
 0x363   : > { %v1717_v42 = vpop.f32.mrf.mxu1 }
 0x364   : > { %v630_v43 = vpop.xlane.xlu1 %629 }
 0x365   : > { %v631_v44 = vsub.f32 %v627_v37, %v630_v43 }
 0x367   : > { %v632_v45 = vmul.f32 1.442695, %v631_v44 }
 0x369   : > { %1214 = vpow2.f32 %v632_v45 }
 0x36b   : > { %v826_v46 = vpop.f32.mrf.mxu1 }
 0x36c   : > { %v829_v47 = vmul.f32 0.35355338, %v826_v46  ;;  %v742_v48 = vpop.xlane.xlu0 %741  ;;  %v1208_v46 = vld [vmem:[%s1787_s8] ss:$0 sm:$0xff] }
 0x36d   : > { %v743_v49 = vsub.f32 %v739_v40, %v742_v48 }
 0x36e   : > { %v830_v50 = vsel %vm534_vm1, %v829_v47, -inf }
 0x36f   : > { %831 = vmax.xlane.f32.xlu2 %v830_v50  ;;  %v744_v51 = vmul.f32 1.442695, %v743_v49  ;;  %v1215_v52 = vpop.eup %1214  ;;  %v1209_v49 = vld [vmem:[%s1788_s9] ss:$0 sm:$0xff] }
 0x370   : > { %v634_v53 = vsel %vm534_vm1, %v1215_v52, 0.0 }
 0x371   : > { %1216 = vpow2.f32 %v744_v51 }
 0x377   : > { %635 = vadd.xlane.f32.xlu2 %v634_v53  ;;  %v1217_v54 = vpop.eup %1216 }
 0x378   : > { %v746_v55 = vsel %vm534_vm1, %v1217_v54, 0.0 }
 0x37f   : > { %747 = vadd.xlane.f32.xlu2 %v746_v55  ;;  %v842_v56 = vpop.permute.xlu0 %841 }
 0x380   : > { %862 = vmatpush.msrb.mxu3 %v842_v56 }
 0x397   : > { %751 = vrot.lane.b32.xlu2 %v1695_v15, %s1470_s24 }
 0x3e2   : > { %v832_v57 = vpop.xlane.xlu2 %831 }
 0x3e3   : > { %v833_v58 = vsub.f32 %v829_v47, %v832_v57 }
 0x3e5   : > { %v834_v59 = vmul.f32 1.442695, %v833_v58 }
 0x3e7   : > { %1218 = vpow2.f32 %v834_v59 }
 0x3ea   : > { %v636_v63 = vpop.xlane.xlu2 %635 }
 0x3ed   : > { %v1219_v60 = vpop.eup %1218 }
 0x3ee   : > { %v836_v61 = vsel %vm534_vm1, %v1219_v60, 0.0 }
 0x3ef   : > { %837 = vadd.xlane.f32.xlu1 %v836_v61 }
 0x3f2   : > { %v748_v2 = vpop.xlane.xlu2 %747 }
 0x3fa   : > { %v752_v6 = vpop.permute.xlu2 %751 }
 0x408   : > { %639 = vrot.lane.b32.xlu1 %v1695_v15, %s1471_s29 }
 0x462   : > { %v838_v62 = vpop.xlane.xlu1 %837 }
 0x463   : > { %1220 = vrcp.f32 %v838_v62 }
 0x464   : > { %1222 = vrcp.f32 %v636_v63 }
 0x465   : > { %1224 = vrcp.f32 %v748_v2 }
 0x466   : > { %1226 = vrcp.f32 %v1472_v26 }
 0x469   : > { %v1221_v0 = vpop.eup %1220 }
 0x46a   : > { %v840_v1 = vmul.f32 %v1221_v0, %v1219_v60  ;;  %v1223_v3 = vpop.eup %1222 }
 0x46b   : > { %v638_v5 = vmul.f32 %v1223_v3, %v1215_v52  ;;  %v1225_v7 = vpop.eup %1224 }
 0x46c   : > { %1107 = vmatmul.msk.f32.vlgmr.msrb.gmra.mxu3 %vm534_vm1, %v840_v1  ;;  %v750_v9 = vmul.f32 %v1225_v7, %v1217_v54  ;;  %v1227_v27 = vpop.eup %1226 }
 0x46d   : > { %v903_v28 = vmul.f32 32.0, %v1227_v27  ;;  %vm907_vm2 = vweird.f32 %v1227_v27 }
 0x46f   : > { %v904_v29 = vsub.f32 1.0, %v903_v28 }
 0x471   : > { %v905_v30 = vmul.f32 %v1227_v27, %v904_v29 }
 0x473   : > { %v906_v31 = vadd.f32 %v1227_v27, %v905_v30 }
 0x475   : > { %v908_v32 = vsel %vm907_vm2, %v1227_v27, %v906_v31 }
 0x47a   : > { %v640_v4 = vpop.permute.xlu1 %639 }
 0x47b   : > { %660 = vmatpush.msrb.mxu2 %v640_v4 }
 0x47c   : > { %1098 = vmatmul.msk.f32.vlgmr.msrb.gmra.mxu2 %vm534_vm1, %v638_v5 }
 0x47d   : > { %772 = vmatpush.msra.mxu2 %v752_v6 }
 0x47f   : > { %885 = vmatpush.msrb.mxu2 %v533_v10 }
 0x484   : > { %1103 = vmatmul.msk.f32.vlgmr.msra.gmra.mxu2 %vm534_vm1, %v750_v9 }
 0x4ef   : > { %v864_v13 = vpop.f32.mrf.mxu3 }
 0x4f0   : > { %1108 = vmatmul.msk.f32.vlgmr.msrb.gmra.mxu2 %vm534_vm1, %v864_v13 }
 0x4ff   : > { %v662_v14 = vpop.f32.mrf.mxu2 }
 0x500   : > { %1099 = vmatmul.msk.f32.vlgmr.msrb.gmra.mxu0 %vm534_vm1, %v662_v14 }
 0x507   : > { %v774_v15 = vpop.f32.mrf.mxu2 }
 0x508   : > { %1104 = vmatmul.msk.f32.vlgmr.msra.gmra.mxu0 %vm534_vm1, %v774_v15 }
 0x573   : > { %v887_v21 = vpop.f32.mrf.mxu2 }
 0x57d   : > { %v685_v16 = vpop.f32.mrf.mxu0 }
 0x57e   : > { %v709_v17 = vadd.f32 %v1717_v42, %v685_v16 }
 0x585   : > { %v797_v18 = vpop.f32.mrf.mxu0 }
 0x586   : > { %v800_v19 = vadd.f32 %v797_v18, %v709_v17 }
 0x588   : > { %v890_v22 = vadd.f32 %v887_v21, %v800_v19 }
 0x58a   : > { %v895_v23 = vadd.f32 %v1207_v20, %v890_v22 }
 0x58c   : > { %v896_v24 = vadd.f32 %v895_v23, %v1684_v8 }
 0x58e   : > { %v899_v25 = vsel %vm475_vm0, %v896_v24, 0.0 }
 0x58f   : > { %900 = vadd.xlane.f32.xlu0 %v899_v25 }
 0x602   : > { %v901_v33 = vpop.xlane.xlu0 %900 }
 0x603   : > { %v909_v34 = vmul.f32 %v908_v32, %v901_v33 }
 0x605   : > { %v910_v35 = vsub.f32 %v896_v24, %v909_v34 }
 0x607   : > { %v911_v36 = vmul.f32 %v910_v35, %v910_v35 }
 0x609   : > { %v912_v37 = vsel %vm475_vm0, %v911_v36, 0.0 }
 0x60a   : > { %913 = vadd.xlane.f32.xlu1 %v912_v37 }
 0x67d   : > { %v914_v8 = vpop.xlane.xlu1 %913 }
 0x67e   : > { %v915_v38 = vmul.f32 %v914_v8, %v908_v32 }
 0x680   : > { %v916_v39 = vadd.f32 1e-05, %v915_v38 }
 0x682   : > { %1228 = vrsqrt.f32 %v916_v39  ;;  %vm923_vm4 = vweird.f32 %v916_v39 }
 0x688   : > { %v1229_v40 = vpop.eup %1228 }
 0x689   : > { %v918_v41 = vmul.f32 %v1229_v40, %v916_v39  ;;  %vm924_vm3 = vweird.f32 %v1229_v40 }
 0x68a   : > { %vm925_vm5 = vmor %vm923_vm4, %vm924_vm3 }
 0x68b   : > { %v919_v42 = vmul.f32 %v1229_v40, %v918_v41 }
 0x68d   : > { %v920_v43 = vmul.f32 0.5, %v919_v42 }
 0x68f   : > { %v921_v44 = vsub.f32 1.5, %v920_v43 }
 0x691   : > { %v922_v45 = vmul.f32 %v1229_v40, %v921_v44 }
 0x693   : > { %v926_v47 = vsel %vm925_vm5, %v1229_v40, %v922_v45 }
 0x694   : > { %v927_v48 = vmul.f32 %v926_v47, %v910_v35 }
 0x696   : > { %v931_v50 = vmul.f32 %v1208_v46, %v927_v48 }
 0x698   : > { %v935_v51 = vadd.f32 %v1209_v49, %v931_v50 }
 0x69a   : > { %936 = vst.msk [vmem:[%s464_s20] sm:$0xff] %vm475_vm0, %v935_v51 }
 0x69b   : > { %1407 = shalt.err (!%p1404_p10)
}
 0x69c   : > { %1129 = dma.vmem_to_hbm [thread:$0]  (%p1608_p0), %s951_s23, 128, %s953_s11, %s938_s18  }
 0x69d PF: > { %s1815_s15 = sld [smem:[#allocation17_spill]] }
 0x69e   : > { %s1817_s12 = sld [smem:[#allocation19_spill]] }
 0x6a3   : > { %s964_s17 = sand.u32 1, %s1815_s15  }
 0x6a4   : > { %p1818_p12 = scmp.ge.s32.totalorder %s1817_s12, 2  ;;  %s965_s13 = scalar_lea.sflag [#allocation4], %s964_s17 }
 0x6a6   : > { %p1149_p5 = pnand %p1818_p12, %p1614_p6 }
 0x6a8   : > { %p1150_p11 = pneg %p1149_p5 }
 0x6aa   : > { %1441 = dma.done.wait (%p1150_p11), %s965_s13, 128  }
 0x6ab   : > { %1443 = vsyncadd (%p1150_p11), %s965_s13, 4294967168  ;;  %s1819_s16 = sld [smem:[#allocation20_spill]]  ;;  %s1822_s13 = smov %s1450_s14 }
 0x6ac   : > { %s1820_s21 = sld [smem:[#allocation18_spill]] }
 0x6ad   : > { %s1821_s15 = sld [smem:[#allocation21_spill]] }
 0x6b1   : > { %p27_p2 = scmp.ge.s32.totalorder %s1819_s16, 4  }
 0x6b2   : > { %s1823_s14 = smov %s1820_s21 }
 0x6b3   :  { %29 = sbr.rel (!%p27_p2) target bundleno = 12 (0xc), region = 130 }
 0x6b8   :  { %971 = vsyncpa [#allocation3], 1 }
 0x6b9   :  { %973 = vsyncpa [#allocation3 + $0x1], 1 }
 0x6ba   :  { %974 = vsyncpa [#allocation6], 1 }
 0x6bb   :  { %976 = vsyncpa [#allocation6 + $0x1], 1 }
 0x6bc   :  { %977 = vsyncpa [#allocation9], 1 }
 0x6bd   :  { %978 = vsyncpa [#allocation4], 1 }
 0x6be   :  { %980 = vsyncpa [#allocation4 + $0x1], 1 }

</bundles_post_ra>
